<compile_context>
chip_gen: v7x
topology: tpu7x:2x2x1
jax: 0.10.0
libtpu: 0.0.40
codegen_flags: <defaults>
</compile_context>

<pallas_src>
import jax
import jax.numpy as jnp
from jax.experimental import pallas as pl
from jax.experimental.pallas import tpu as pltpu


# itemsize (bytes) -> minimum sublane multiple for packed layouts.
_SUBLANE_MIN = {4: 8, 2: 16, 1: 32}
_LANE = 128


def _catter_kernel(*refs):
    """refs = (*in_refs, out_ref); each ref is a (TR, D) VMEM tile.

    Copies every input tile into its static lane-offset window of the output
    tile. Offsets are static, so this lowers to plain vector stores (masked
    only where a width / offset is not 128-aligned, which the wrapper already
    minimizes by coalescing adjacent ragged inputs).
    """
    in_refs = refs[:-1]
    out_ref = refs[-1]
    off = 0
    for r in in_refs:
        d = r.shape[-1]
        out_ref[:, off:off + d] = r[...]
        off += d


def _round_down(x, m):
    return max((x // m) * m, m)


def _round_up(x, m):
    return ((x + m - 1) // m) * m


def _vmem_capacity_bytes():
    try:
        return int(pltpu.get_tpu_info().vmem_capacity_bytes)
    except Exception:
        return 64 << 20  # conservative fallback (v7x per-TC VMEM size)


def _group_for_alignment(widths):
    """Group consecutive inputs so every group boundary is a 128-lane offset."""
    groups, cur, cum = [], [], 0
    for idx, w in enumerate(widths):
        cur.append(idx)
        cum += w
        if cum % _LANE == 0:
            groups.append(cur)
            cur = []
    if cur:
        groups.append(cur)
    return groups


def catter(xs, *, min_pallas_bytes=4 << 20, vmem_budget_bytes=None,
           coalesce=True, input_buffering=None):
    """Concatenate arrays along the last dim (torch.cat(xs, dim=-1) semantics)."""
    xs = list(xs)
    assert len(xs) >= 1
    lead = xs[0].shape[:-1]
    dtype = xs[0].dtype
    for x in xs:
        assert x.shape[:-1] == lead, "leading dims must match for cat(dim=-1)"
        assert x.dtype == dtype, "dtypes must match"

    widths = [int(x.shape[-1]) for x in xs]
    d_total = sum(widths)
    out_full_shape = lead + (d_total,)

    rows = 1
    for s in lead:
        rows *= int(s)

    itemsize = jnp.dtype(dtype).itemsize
    total_out_bytes = rows * d_total * itemsize

    if len(xs) == 1:
        return xs[0]
    # Fast path: small / degenerate concats are strictly better left to XLA.
    if total_out_bytes < min_pallas_bytes or rows == 0 or d_total == 0:
        return jnp.concatenate(xs, axis=-1)

    # Lane-dense 2-D views: (rows, D_i).
    xs2d = [x.reshape(rows, w) for x, w in zip(xs, widths)]

    # Coalesce consecutive inputs so in-kernel lane offsets land on 128-lane
    # boundaries (unmasked vst); the per-group pre-concat is done by XLA in the
    # wrapper. Skip when it would not actually reduce the input count.
    if coalesce:
        groups = _group_for_alignment(widths)
        if 1 < len(groups) < len(xs2d):
            merged, merged_w = [], []
            for g in groups:
                if len(g) == 1:
                    merged.append(xs2d[g[0]])
                else:
                    merged.append(jnp.concatenate([xs2d[i] for i in g], axis=-1))
                merged_w.append(sum(widths[i] for i in g))
            xs2d, widths = merged, merged_w

    # Highly fragmented concat: per-input DMA descriptors + double buffers per
    # grid step dominate; let XLA's fused concatenate handle it.
    if len(xs2d) > 32:
        return jnp.concatenate(xs, axis=-1)

    # bf16 / int8 lane packing: reinterpret as uint32 when every width stays a
    # 128-lane multiple after packing (halves / quarters the vst count).
    kernel_dtype = dtype
    pack = (4 // itemsize) if itemsize in (1, 2) else 1
    packed = pack > 1 and all(w % (pack * _LANE) == 0 for w in widths)
    if packed:
        xs2d = [jax.lax.bitcast_convert_type(
                    x.reshape(rows, w // pack, pack), jnp.uint32)
                for x, w in zip(xs2d, widths)]
        widths = [w // pack for w in widths]
        kernel_dtype = jnp.uint32

    k_itemsize = jnp.dtype(kernel_dtype).itemsize
    k_d_total = sum(widths)

    # Capacity-aware VMEM sizing (v7x: 64 MiB/TC, v5e/v6e: 128 MiB).
    cap = _vmem_capacity_bytes()
    if vmem_budget_bytes is None:
        vmem_budget_bytes = (24 << 20) if cap <= (64 << 20) else (88 << 20)
    vmem_budget_bytes = min(int(vmem_budget_bytes), int(cap * 0.70))

    sublane = _SUBLANE_MIN.get(k_itemsize, 8)
    # Resident footprint ~= double-buffered inputs + double-buffered output
    # ~= 4 * TR * D_total * itemsize. Budget is the only hard bound on TR.
    tr = vmem_budget_bytes // max(4 * k_d_total * k_itemsize, 1)
    tr = _round_down(int(tr), sublane)

    if tr >= rows:
        # Never collapse to a single-step grid: split into >=2 row blocks so the
        # "parallel" row axis can shard across both v7x TensorCores.
        half = _round_up(-(-rows // 2), sublane)
        tr = half if half < rows else rows
    grid = (pl.cdiv(rows, tr),)

    footprint = 4 * tr * k_d_total * k_itemsize
    vmem_limit = int(min(max(int(footprint * 1.25) + (2 << 20), 16 << 20),
                         int(cap * 0.80)))

    # Optional deeper input buffering (e.g. 3 on v5e if DMA is still exposed).
    if input_buffering is not None and input_buffering > 2:
        in_specs = [pl.BlockSpec((tr, w), lambda i: (i, 0),
                                 pipeline_mode=pl.Buffered(int(input_buffering)))
                    for w in widths]
    else:
        in_specs = [pl.BlockSpec((tr, w), lambda i: (i, 0)) for w in widths]

    call = pl.pallas_call(
        _catter_kernel,
        out_shape=jax.ShapeDtypeStruct((rows, k_d_total), kernel_dtype),
        grid_spec=pltpu.PrefetchScalarGridSpec(
            num_scalar_prefetch=0,
            grid=grid,
            in_specs=in_specs,
            out_specs=pl.BlockSpec((tr, k_d_total), lambda i: (i, 0)),
        ),
        compiler_params=pltpu.CompilerParams(
            dimension_semantics=("parallel",),
            vmem_limit_bytes=vmem_limit,
        ),
        cost_estimate=pl.CostEstimate(
            flops=0, transcendentals=0, bytes_accessed=2 * total_out_bytes),
    )
    out2d = call(*xs2d)

    if packed:
        out2d = jax.lax.bitcast_convert_type(out2d, dtype).reshape(rows, d_total)
    return out2d.reshape(out_full_shape)


if __name__ == "__main__":
    key = jax.random.PRNGKey(0)
    keys = jax.random.split(key, 10)

    # --- Test 1: small ragged widths (32 / 64 / 32 -> 128), force Pallas path.
    x1 = jax.random.normal(keys[0], (2, 8, 32), dtype=jnp.float32)
    x2 = jax.random.normal(keys[1], (2, 8, 64), dtype=jnp.float32)
    x3 = jax.random.normal(keys[2], (2, 8, 32), dtype=jnp.float32)
    xs = [x1, x2, x3]
    out = jax.block_until_ready(catter(xs, min_pallas_bytes=0))
    ref = jnp.concatenate(xs, axis=-1)
    assert out.shape == ref.shape and out.dtype == ref.dtype
    assert bool(jnp.array_equal(out, ref)), "Pallas cat mismatch (test 1)"

    # Default fast-path (tiny input -> jnp.concatenate bypass) must also match.
    out_fast = jax.block_until_ready(catter(xs))
    assert bool(jnp.array_equal(out_fast, ref)), "fast-path mismatch"

    # --- Test 2: multi-step row grid (tiny VMEM budget -> TR=128, 8 steps) to
    # validate tiling + pipelining.
    y1 = jax.random.normal(keys[3], (2, 512, 64), dtype=jnp.float32)
    y2 = jax.random.normal(keys[4], (2, 512, 64), dtype=jnp.float32)
    ys = [y1, y2]
    out2 = jax.block_until_ready(
        catter(ys, min_pallas_bytes=0, vmem_budget_bytes=256 << 10))
    ref2 = jnp.concatenate(ys, axis=-1)
    assert out2.shape == ref2.shape
    assert bool(jnp.array_equal(out2, ref2)), "Pallas cat mismatch (test 2, tiled)"

    # --- Test 3: ragged widths that coalesce to 128-lane groups
    # ([32,96] -> 128, [128], [64,64] -> 128).
    zs = [jax.random.normal(keys[5 + i], (4, 128, w), dtype=jnp.float32)
          for i, w in enumerate([32, 96, 128, 64])]
    zs.append(jax.random.normal(keys[9], (4, 128, 64), dtype=jnp.float32))
    out3 = jax.block_until_ready(catter(zs, min_pallas_bytes=0))
    ref3 = jnp.concatenate(zs, axis=-1)
    assert out3.shape == ref3.shape
    assert bool(jnp.array_equal(out3, ref3)), "Pallas cat mismatch (test 3, coalesced)"

    # --- Test 4: bf16 inputs with 256-lane widths -> uint32 packing path.
    b1 = jax.random.normal(keys[5], (2, 128, 256), dtype=jnp.bfloat16)
    b2 = jax.random.normal(keys[6], (2, 128, 256), dtype=jnp.bfloat16)
    bs = [b1, b2]
    out4 = jax.block_until_ready(catter(bs, min_pallas_bytes=0))
    ref4 = jnp.concatenate(bs, axis=-1)
    assert out4.shape == ref4.shape and out4.dtype == ref4.dtype
    assert bool(jnp.array_equal(out4, ref4)), "Pallas cat mismatch (test 4, bf16 packed)"

    print("KERNEL_OK")
</pallas_src>

<mosaic_0001>
module attributes {stable_mosaic.version = 11 : i64} {
  func.func @_catter_kernel(%arg0: i32, %arg1: memref<8x32xf32, #tpu.memory_space<vmem>>, %arg2: memref<8x64xf32, #tpu.memory_space<vmem>>, %arg3: memref<8x32xf32, #tpu.memory_space<vmem>>, %arg4: memref<8x128xf32, #tpu.memory_space<vmem>>) attributes {dimension_semantics = [#tpu.dimension_semantics<parallel>], iteration_bounds = array<i64: 2>, scalar_prefetch = 0 : i64, scratch_operands = 0 : i64, tpu.core_type = #tpu.core_type<tc>, window_params = [{transform_indices = @transform_0, window_bounds = array<i64: 8, 32>}, {transform_indices = @transform_1, window_bounds = array<i64: 8, 64>}, {transform_indices = @transform_2, window_bounds = array<i64: 8, 32>}, {transform_indices = @transform_3, window_bounds = array<i64: 8, 128>}]} {
    %c0 = arith.constant 0 : index
    %c0_0 = arith.constant 0 : index
    %0 = vector.load %arg1[%c0, %c0_0] : memref<8x32xf32, #tpu.memory_space<vmem>>, vector<8x32xf32>
    %c0_1 = arith.constant 0 : index
    %c0_2 = arith.constant 0 : index
    %1 = vector.load %arg4[%c0_1, %c0_2] : memref<8x128xf32, #tpu.memory_space<vmem>>, vector<8x32xf32>
    tpu.vector_store %arg4[%c0_1, %c0_2], %0 {strides = array<i32>} : memref<8x128xf32, #tpu.memory_space<vmem>>, vector<8x32xf32>,
    %c0_3 = arith.constant 0 : index
    %c0_4 = arith.constant 0 : index
    %2 = vector.load %arg2[%c0_3, %c0_4] : memref<8x64xf32, #tpu.memory_space<vmem>>, vector<8x64xf32>
    %c0_5 = arith.constant 0 : index
    %c32 = arith.constant 32 : index
    %3 = vector.load %arg4[%c0_5, %c32] : memref<8x128xf32, #tpu.memory_space<vmem>>, vector<8x64xf32>
    tpu.vector_store %arg4[%c0_5, %c32], %2 {strides = array<i32>} : memref<8x128xf32, #tpu.memory_space<vmem>>, vector<8x64xf32>,
    %c0_6 = arith.constant 0 : index
    %c0_7 = arith.constant 0 : index
    %4 = vector.load %arg3[%c0_6, %c0_7] : memref<8x32xf32, #tpu.memory_space<vmem>>, vector<8x32xf32>
    %c0_8 = arith.constant 0 : index
    %c96 = arith.constant 96 : index
    %5 = vector.load %arg4[%c0_8, %c96] : memref<8x128xf32, #tpu.memory_space<vmem>>, vector<8x32xf32>
    tpu.vector_store %arg4[%c0_8, %c96], %4 {strides = array<i32>} : memref<8x128xf32, #tpu.memory_space<vmem>>, vector<8x32xf32>,
    return
  }
  func.func @transform_0(%arg0: i32) -> (i32, i32) {
    %c0_i32 = arith.constant 0 : i32
    %c0_i32_0 = arith.constant 0 : i32
    return %arg0, %c0_i32 : i32, i32
  }
  func.func @transform_1(%arg0: i32) -> (i32, i32) {
    %c0_i32 = arith.constant 0 : i32
    %c0_i32_0 = arith.constant 0 : i32
    return %arg0, %c0_i32 : i32, i32
  }
  func.func @transform_2(%arg0: i32) -> (i32, i32) {
    %c0_i32 = arith.constant 0 : i32
    %c0_i32_0 = arith.constant 0 : i32
    return %arg0, %c0_i32 : i32, i32
  }
  func.func @transform_3(%arg0: i32) -> (i32, i32) {
    %c0_i32 = arith.constant 0 : i32
    %c0_i32_0 = arith.constant 0 : i32
    return %arg0, %c0_i32 : i32, i32
  }
}

</mosaic_0001>

<bundles_post_ra>
// kernel: tpu_custom_call.1
= control target key start
LH: loop header
LB: loop body
LE: loop exit
PB: predicated region body
PF: predicated region fallthrough
CT: control target
= control target key end

     0   :  { %s894_s0 = inlined_call_operand.hbm [shape: f32[16,32], index: 0, kind: input, shape index: {}]   ;;  %s895_s1 = inlined_call_operand.hbm [shape: f32[16,64], index: 1, kind: input, shape index: {}]   ;;  %s896_s2 = inlined_call_operand.hbm [shape: f32[16,32], index: 2, kind: input, shape index: {}]   ;;  %s897_s3 = inlined_call_operand.hbm [shape: f32[16,128], index: 3, kind: output, shape index: {}]  }
   0x1   :  { %902 = sst [smem:[#allocation12_spill]] %s895_s1 }
   0x2   :  { %8 = vsyncpa [#allocation3], 0 }
   0x3   :  { %10 = vsyncpa [#allocation3 + $0x1], 0 }
   0x4   :  { %11 = vsyncpa [#allocation6], 0 }
   0x5   :  { %13 = vsyncpa [#allocation6 + $0x1], 0 }
   0x6   :  { %14 = vsyncpa [#allocation4], 0 }
   0x7   :  { %16 = vsyncpa [#allocation4 + $0x1], 0  ;;  %s665_s12 = smov 0   ;;  %s667_s13 = smov 0  }
   0x8   :  { %s669_s14 = smov 0   ;;  %s671_s15 = smov 0  }
   0x9 LB: > { %s686_s16 = sadd.s32 4294967295, %s637_s15   ;;  %s401_s17 = sadd.s32 4294967294, %s637_s15   ;;  %s637_s15 = sphi %s671_s15, %s921_s15   ;;  %s633_s14 = sphi %s669_s14, %s920_s14   ;;  %s629_s13 = sphi %s667_s13, %s919_s13   ;;  %s625_s12 = sphi %s665_s12, %s918_s12  }
   0xa   : > { %s690_s18 = sadd.s32 1, %s637_s15   ;;  %s29_s19 = sadd.s32 1, %s633_s14 }
   0xb   : > { %s26_s20 = ssub.s32 %s637_s15, %s690_s18  ;;  %p36_p0 = scmp.ne.s32.totalorder %s633_s14, %s629_s13 }
   0xc   : > { %p27_p1 = scmp.eq.s32.totalorder %s26_s20, 0  ;;  %p37_p2 = scmp.eq.s32.totalorder %s637_s15, 0 }
   0xd   : > { %p42_p3 = scmp.ne.s32.totalorder %s629_s13, %s625_s12  ;;  %p43_p4 = scmp.eq.s32.totalorder %s686_s16, 0 }
   0xe   : > { %s702_s21 = scalar_select %p27_p1, %s633_s14, %s29_s19  }
   0xf   : > { %p38_p5 = por %p37_p2, %p36_p0  ;;  %p704_p6 = por %p43_p4, %p42_p3 }
  0x10   : > { %p118_p7 = scmp.eq.s32.totalorder %s686_s16, 1  ;;  %p124_p8 = scmp.eq.s32.totalorder %s401_s17, 1 }
  0x11   : > { %s903_s22 = scalar_select %p704_p6, 1, 0 }
  0x12   : > { %p441_p10 = scmp.lt.s32.totalorder %s637_s15, 2  ;;  %p711_p11 = por %p118_p7, %p36_p0 }
  0x13   : > { %p715_p12 = por %p124_p8, %p42_p3  ;;  %s144_s25 = sand.u32 1, %s633_s14  }
  0x14   : > { %s904_s23 = scalar_select %p711_p11, 1, 0 }
  0x15   : > { %s905_s24 = scalar_select %p715_p12, 1, 0 }
  0x16   : > { %s721_s26 = sshll.u32 %s637_s15, 7  ;;  %s725_s27 = sshll.u32 %s144_s25, 3 }
  0x17   : > { %p727_p13 = pnand %p441_p10, %p38_p5  ;;  %s162_s29 = sand.u32 1, %s637_s15  }
  0x18   : > { %s907_s1 = sld [smem:[#allocation12_spill]]  ;;  %s166_s6 = scalar_lea.vmem [#allocation5], %s725_s27 }
  0x19   : > { %s906_s28 = scalar_select %p727_p13, 1, 0 }
  0x1a   : > { %s173_s7 = sshll.u32 %s166_s6, 4  ;;  %s742_s8 = scalar_lea.sflag [#allocation6], %s162_s29  ;;  %s739_s7 = int_to_ptr.vmem [resolvable:$true] %s173_s7 }
  0x1b   : > { %p748_p2 = pneg %p727_p13 }
  0x1e   : > { %s736_s5 = scalar_lea.hbm %s907_s1, %s721_s26  ;;  %s482_s19 = scalar_lea.hbm %s907_s1, 256 }
  0x1f   : > { %s477_s9 = scalar_lea.hbm %s736_s5, 128  ;;  %p483_p5 = scmp.lt.u32.totalorder %s736_s5, %s907_s1 }
  0x20   : > { %p478_p1 = scmp.ne.s32.totalorder %s736_s5, %s477_s9  ;;  %p484_p7 = scmp.lt.u32.totalorder %s482_s19, %s477_s9 }
  0x21   : > { %p486_p10 = scmp.lt.u32.totalorder %s477_s9, %s736_s5 }
  0x22   : > { %p480_p3 = pnand %p748_p2, %p478_p1  ;;  %p485_p8 = por %p484_p7, %p483_p5 }
  0x24   : > { %p481_p4 = pneg %p480_p3  ;;  %p487_p9 = por %p486_p10, %p485_p8 }
  0x26   : > { %p488_p0 = pnand %p487_p9, %p481_p4 }
  0x28   : > { %491 = shalt.err (!%p488_p0)
}
  0x29   : > { %s492_s29 = scalar_lea.vmem %s739_s7, 128  ;;  %s639_s4 = smov [#allocation5]  }
  0x2a   : > { %p493_p1 = scmp.ne.s32.totalorder %s739_s7, %s492_s29  ;;  %s497_s6 = sshll.u32 %s639_s4, 4  ;;  %s498_s6 = int_to_ptr.vmem [resolvable:$false] %s497_s6 }
  0x2b   : > { %s499_s11 = scalar_lea.vmem %s498_s6, 256  ;;  %p500_p11 = scmp.lt.s32.totalorder %s739_s7, %s498_s6 }
  0x2c   : > { %p495_p3 = pnand %p493_p1, %p748_p2  ;;  %p501_p6 = scmp.lt.s32.totalorder %s499_s11, %s492_s29 }
  0x2e   : > { %p496_p12 = pneg %p495_p3  ;;  %p502_p5 = por %p501_p6, %p500_p11 }
  0x30   : > { %p503_p7 = pnand %p502_p5, %p496_p12 }
  0x32   : > { %506 = shalt.err (!%p503_p7)
}
  0x33   : > { %433 = dma.hbm_to_vmem [thread:$0]  (!%p727_p13), %s736_s5, 128, %s739_s7, %s742_s8  }
  0x34   : > { %p196_p9 = scmp.lt.s32.totalorder %s637_s15, 3  ;;  %s777_s19 = scalar_lea.hbm %s894_s0, %s721_s26 }
  0x35   : > { %p909_p6 = scmp.ge.s32.totalorder %s637_s15, 1  ;;  %s148_s30 = scalar_lea.vmem [#allocation2], %s725_s27 }
  0x36   : > { %s155_s29 = sshll.u32 %s148_s30, 4  ;;  %s145_s5 = scalar_lea.sflag [#allocation3], %s144_s25  ;;  %s156_s29 = int_to_ptr.vmem [resolvable:$true] %s155_s29 }
  0x37   : > { %p781_p11 = pnand %p909_p6, %p196_p9  ;;  %s507_s7 = scalar_lea.hbm %s777_s19, 128 }
  0x38   : > { %p508_p12 = scmp.ne.s32.totalorder %s777_s19, %s507_s7  ;;  %s512_s11 = scalar_lea.hbm %s894_s0, 256 }
  0x39   : > { %s910_s20 = scalar_select %p781_p11, 1, 0 }
  0x3a   : > { %p510_p0 = pnand %p508_p12, %p748_p2  ;;  %p513_p8 = scmp.lt.u32.totalorder %s777_s19, %s894_s0 }
  0x3b   : > { %p514_p10 = scmp.lt.u32.totalorder %s512_s11, %s507_s7  ;;  %p516_p3 = scmp.lt.u32.totalorder %s507_s7, %s777_s19 }
  0x3c   : > { %p511_p4 = pneg %p510_p0 }
  0x3d   : > { %p515_p1 = por %p514_p10, %p513_p8 }
  0x3f   : > { %p517_p5 = por %p516_p3, %p515_p1 }
  0x41   : > { %p518_p7 = pnand %p517_p5, %p511_p4 }
  0x43   : > { %521 = shalt.err (!%p518_p7)
}
  0x44   : > { %s522_s25 = scalar_lea.vmem %s156_s29, 128  ;;  %s640_s30 = smov [#allocation2]  }
  0x45   : > { %p523_p9 = scmp.ne.s32.totalorder %s156_s29, %s522_s25  ;;  %s527_s1 = sshll.u32 %s640_s30, 4  ;;  %s528_s1 = int_to_ptr.vmem [resolvable:$false] %s527_s1 }
  0x46   : > { %s529_s4 = scalar_lea.vmem %s528_s1, 256  ;;  %p530_p0 = scmp.lt.s32.totalorder %s156_s29, %s528_s1 }
  0x47   : > { %p525_p6 = pnand %p523_p9, %p748_p2  ;;  %p531_p11 = scmp.lt.s32.totalorder %s529_s4, %s522_s25 }
  0x49   : > { %p526_p12 = pneg %p525_p6  ;;  %p532_p13 = por %p531_p11, %p530_p0 }
  0x4b   : > { %p533_p8 = pnand %p532_p13, %p526_p12 }
  0x4d   : > { %536 = shalt.err (!%p533_p8)
}
  0x4e   : > { %p911_p10 = scmp.ne.s32.totalorder %s906_s28, 0  ;;  %s809_s11 = scalar_lea.hbm %s896_s2, %s721_s26 }
  0x4f   : > { %s184_s1 = scalar_lea.vmem [#allocation7], %s725_s27  ;;  %s537_s17 = scalar_lea.hbm %s809_s11, 128 }
  0x50   : > { %430 = dma.hbm_to_vmem [thread:$0]  (!%p911_p10), %s777_s19, 128, %s156_s29, %s145_s5  }
  0x51   : > { %s191_s9 = sshll.u32 %s184_s1, 4  ;;  %p538_p13 = scmp.ne.s32.totalorder %s809_s11, %s537_s17  ;;  %s192_s9 = int_to_ptr.vmem [resolvable:$true] %s191_s9 }
  0x52   : > { %s542_s19 = scalar_lea.hbm %s896_s2, 256  ;;  %p543_p1 = scmp.lt.u32.totalorder %s809_s11, %s896_s2 }
  0x53   : > { %p540_p11 = pnand %p538_p13, %p748_p2  ;;  %p544_p3 = scmp.lt.u32.totalorder %s542_s19, %s537_s17 }
  0x54   : > { %p546_p7 = scmp.lt.u32.totalorder %s537_s17, %s809_s11 }
  0x55   : > { %p541_p4 = pneg %p540_p11  ;;  %p545_p5 = por %p544_p3, %p543_p1 }
  0x57   : > { %p547_p9 = por %p546_p7, %p545_p5 }
  0x59   : > { %p548_p6 = pnand %p547_p9, %p541_p4 }
  0x5b   : > { %551 = shalt.err (!%p548_p6)
}
  0x5c   : > { %s552_s26 = scalar_lea.vmem %s192_s9, 128  ;;  %s641_s27 = smov [#allocation7]  }
  0x5d   : > { %p553_p12 = scmp.ne.s32.totalorder %s192_s9, %s552_s26  ;;  %s557_s4 = sshll.u32 %s641_s27, 4  ;;  %s558_s4 = int_to_ptr.vmem [resolvable:$false] %s557_s4 }
  0x5e   : > { %s559_s7 = scalar_lea.vmem %s558_s4, 256  ;;  %p560_p13 = scmp.lt.s32.totalorder %s192_s9, %s558_s4 }
  0x5f   : > { %p555_p0 = pnand %p553_p12, %p748_p2  ;;  %p561_p11 = scmp.lt.s32.totalorder %s559_s7, %s552_s26 }
  0x61   : > { %p556_p8 = pneg %p555_p0  ;;  %p562_p10 = por %p561_p11, %p560_p13 }
  0x63   : > { %p563_p1 = pnand %p562_p10, %p556_p8 }
  0x65   : > { %566 = shalt.err (!%p563_p1)
}
  0x66   : > { %p912_p3 = scmp.ne.s32.totalorder %s906_s28, 0  ;;  %p913_p4 = scmp.ne.s32.totalorder %s910_s20, 0 }
  0x67   : > { %s833_s10 = sand.u32 (!%p913_p4), 1, %s629_s13   ;;  %p914_p2 = scmp.ne.s32.totalorder (!%p913_p4), %s903_s22, 0 }
  0x68   : > { %436 = dma.hbm_to_vmem [thread:$0]  (!%p912_p3), %s809_s11, 128, %s192_s9, %s742_s8  }
  0x69   : > { %200 = sbr.rel (%p913_p4) target bundleno = 250 (0xfa), region = 32  ;;  %s411_s6 = sshll.u32 (!%p913_p4), %s833_s10, 3 }
  0x6a   : > { %s203_s1 = scalar_lea.sflag (!%p913_p4), [#allocation3], %s833_s10  ;;  %s206_s17 = scalar_lea.vmem (!%p913_p4), [#allocation2], %s411_s6 }
  0x70   : > { %612 = dma.done.wait (%p914_p2), %s203_s1, 128  }
  0x71   : > { %614 = vsyncadd (%p914_p2), %s203_s1, 4294967168  ;;  %s211_s28 = sand.u32 1, %s686_s16   ;;  %s215_s20 = scalar_lea.vmem [#allocation5], %s411_s6 }
  0x72   : > { %s212_s8 = scalar_lea.sflag [#allocation6], %s211_s28 }
  0x73   : > { %616 = dma.done.wait (%p914_p2), %s212_s8, 256  }
  0x74   : > { %618 = vsyncadd (%p914_p2), %s212_s8, 4294967040  ;;  %vm258_vm0 = vcmask 261120   ;;  %v260_v0 = vld [vmem:[%s215_s20] sm:$0xff]  ;;  %v257_v1 = vld [vmem:[%s206_s17] sm:$0xff]  ;;  %s642_s11 = smov 32   ;;  %s256_s9 = scalar_lea.vmem [#allocation8], %s411_s6 }
  0x75   : > { %262 = vrot.lane.b32.xlu0 %v260_v0, %s642_s11  ;;  %259 = vst.msk [vmem:[%s256_s9] sm:$0xff] %vm258_vm0, %v257_v1  ;;  %s224_s25 = scalar_lea.vmem [#allocation7], %s411_s6  ;;  %s643_s30 = smov 96   ;;  %vm265_vm1 = vcmask 785664   ;;  %vm272_vm2 = vcmask 1048320  }
  0x76   : > { %v267_v2 = vld [vmem:[%s224_s25] sm:$0xff]  ;;  %s416_s19 = sshll.u32 %s686_s16, 7  ;;  %s288_s29 = sshll.u32 %s256_s9, 4  ;;  %s852_s29 = int_to_ptr.vmem [resolvable:$true] %s288_s29 }
  0x77   : > { %s850_s26 = scalar_lea.hbm %s897_s3, %s416_s19  ;;  %s275_s27 = scalar_lea.sflag [#allocation4], %s833_s10 }
  0x78   : > { %s567_s4 = scalar_lea.vmem %s852_s29, 128  ;;  %p915_p5 = scmp.ne.s32.totalorder %s904_s23, 0 }
  0x79   : > { %269 = vrot.lane.b32.xlu0 %v267_v2, %s643_s30  ;;  %p568_p10 = scmp.ne.s32.totalorder %s852_s29, %s567_s4  ;;  %s644_s16 = smov [#allocation8]  }
  0x7a   : > { %s571_s7 = sshll.u32 %s644_s16, 4  ;;  %s572_s7 = int_to_ptr.vmem [resolvable:$false] %s571_s7 }
  0x7b   : > { %p569_p7 = pnand %p568_p10, %p915_p5  ;;  %s573_s6 = scalar_lea.vmem %s572_s7, 256 }
  0x7c   : > { %p574_p6 = scmp.lt.s32.totalorder %s852_s29, %s572_s7  ;;  %p575_p12 = scmp.lt.s32.totalorder %s573_s6, %s567_s4 }
  0x7d   : > { %p570_p9 = pneg %p569_p7 }
  0x7e   : > { %p576_p0 = por %p575_p12, %p574_p6 }
  0x80   : > { %p577_p8 = pnand %p576_p0, %p570_p9 }
  0xe7   : > { %v263_v3 = vpop.permute.xlu0 %262 }
  0xe8   : > { %266 = vst.msk [vmem:[%s256_s9] sm:$0xff] %vm265_vm1, %v263_v3 }
  0xeb   : > { %v270_v4 = vpop.permute.xlu0 %269 }
  0xec   : > { %273 = vst.msk [vmem:[%s256_s9] sm:$0xff] %vm272_vm2, %v270_v4 }
  0xed   : > { %580 = shalt.err (!%p577_p8)
}
  0xee   : > { %s581_s10 = scalar_lea.hbm %s850_s26, 128  ;;  %s585_s28 = scalar_lea.hbm %s897_s3, 256 }
  0xef   : > { %p582_p13 = scmp.ne.s32.totalorder %s850_s26, %s581_s10  ;;  %p586_p3 = scmp.lt.u32.totalorder %s850_s26, %s897_s3 }
  0xf0   : > { %p587_p4 = scmp.lt.u32.totalorder %s585_s28, %s581_s10  ;;  %p589_p10 = scmp.lt.u32.totalorder %s581_s10, %s850_s26 }
  0xf1   : > { %p583_p11 = pnand %p582_p13, %p915_p5 }
  0xf2   : > { %p588_p2 = por %p587_p4, %p586_p3 }
  0xf3   : > { %p584_p1 = pneg %p583_p11 }
  0xf4   : > { %p590_p7 = por %p589_p10, %p588_p2 }
  0xf6   : > { %p591_p9 = pnand %p590_p7, %p584_p1 }
  0xf8   : > { %594 = shalt.err (!%p591_p9)
}
  0xf9   : > { %425 = dma.vmem_to_hbm [thread:$0]  (%p915_p5), %s852_s29, 128, %s850_s26, %s275_s27  }
  0xfa PF: > { %s300_s11 = sand.u32 1, %s625_s12   ;;  %p916_p6 = scmp.ne.s32.totalorder %s905_s24, 0 }
  0xfb   : > { %p917_p12 = scmp.ge.s32.totalorder %s637_s15, 2  ;;  %s301_s9 = scalar_lea.sflag [#allocation4], %s300_s11 }
  0xfd   : > { %p438_p0 = pnand %p917_p12, %p916_p6 }
  0xff   : > { %620 = dma.done.wait (!%p438_p0), %s301_s9, 128  }
 0x100   : > { %622 = vsyncadd (!%p438_p0), %s301_s9, 4294967168  ;;  %p19_p8 = scmp.ge.s32.totalorder %s690_s18, 4   ;;  %s918_s12 = smov %s629_s13 }
 0x101   : > { %s919_s13 = smov %s633_s14  ;;  %s920_s14 = smov %s702_s21 }
 0x102   : > { %s921_s15 = smov %s690_s18  ;;  %21 = sbr.rel (!%p19_p8) target bundleno = 9 (0x9), region = 101 }
 0x109   :  { %306 = vsyncpa [#allocation3], 1 }
 0x10a   :  { %308 = vsyncpa [#allocation3 + $0x1], 1 }
 0x10b   :  { %309 = vsyncpa [#allocation6], 1 }
 0x10c   :  { %311 = vsyncpa [#allocation6 + $0x1], 1 }
 0x10d   :  { %312 = vsyncpa [#allocation4], 1 }
 0x10e   :  { %314 = vsyncpa [#allocation4 + $0x1], 1 }

</bundles_post_ra>
